<compile_context>
chip_gen: v5e
topology: v5e:2x2
jax: 0.10.0
libtpu: 0.0.40
codegen_flags: <defaults>
</compile_context>

<pallas_src>
import jax
import jax.numpy as jnp
import numpy as np
from jax.experimental import pallas as pl
from jax.experimental.pallas import tpu as pltpu


def _fk_kernel(rot_ref, off_ref, anc_ref, out_ref):
    """rot_ref: [4, J, TB], off_ref: [3, J, 1], anc_ref: [J, J], out_ref: [3, J, TB]."""
    w = rot_ref[0]  # [J, TB]  (joints on sublanes, batch on lanes)
    x = rot_ref[1]
    y = rot_ref[2]
    z = rot_ref[3]

    ox = off_ref[0]  # [J, 1] -> lane-broadcast against [J, TB]
    oy = off_ref[1]
    oz = off_ref[2]

    # Shared quaternion subterms (halves the VALU multiplies of quat->matrix).
    xx = x * x; yy = y * y; zz = z * z
    xy = x * y; xz = x * z; yz = y * z
    wx = w * x; wy = w * y; wz = w * z

    r00 = 1.0 - 2.0 * (yy + zz)
    r01 = 2.0 * (xy - wz)
    r02 = 2.0 * (xz + wy)
    r10 = 2.0 * (xy + wz)
    r11 = 1.0 - 2.0 * (xx + zz)
    r12 = 2.0 * (yz - wx)
    r20 = 2.0 * (xz - wy)
    r21 = 2.0 * (yz + wx)
    r22 = 1.0 - 2.0 * (xx + yy)

    # rotated_j = R_j @ offset_j, vectorized over joints (sublanes) and batch (lanes).
    rx = r00 * ox + r01 * oy + r02 * oz  # [J, TB]
    ry = r10 * ox + r11 * oy + r12 * oz
    rz = r20 * ox + r21 * oy + r22 * oz

    # Chain accumulation on the MXU:
    #   joints[j] = sum_{k non-root ancestor-or-self of j} rotated[k] = (anc @ rotated)[j]
    # Root rows of anc are all-zero -> joints[root] = 0, matching the PyTorch layer.
    anc = anc_ref[...]  # [J, J]
    out_ref[0] = jnp.dot(anc, rx, preferred_element_type=jnp.float32)
    out_ref[1] = jnp.dot(anc, ry, preferred_element_type=jnp.float32)
    out_ref[2] = jnp.dot(anc, rz, preferred_element_type=jnp.float32)


def _ancestor_matrix(parents):
    """anc[j, k] = 1 iff k lies on the path root->j and k is not a root joint."""
    J = len(parents)
    anc = np.zeros((J, J), np.float32)
    for j in range(J):
        k = j
        while k != -1:
            if parents[k] != -1:
                anc[j, k] = 1.0
            k = parents[k]
    return anc


def forward_kinematics(rotations, initial_skeleton, parent_indices, *, batch_tile=1024):
    """rotations: [B, J, 4] f32, initial_skeleton: [J, 3] f32 -> joints [B, J, 3]."""
    B, J, _ = rotations.shape
    parents = tuple(int(p) for p in parent_indices)

    # Bone offsets (glue; zero for roots — roots never contribute to any chain sum).
    parent_gather = jnp.asarray(
        [p if p >= 0 else j for j, p in enumerate(parents)], dtype=jnp.int32)
    offsets = initial_skeleton - initial_skeleton[parent_gather]              # [J, 3]
    off = jnp.transpose(offsets, (1, 0)).astype(jnp.float32)[:, :, None]      # [3, J, 1]

    anc = jnp.asarray(_ancestor_matrix(parents))                              # [J, J]

    # Batch-on-lanes layout for the kernel.
    rot = jnp.transpose(rotations, (2, 1, 0)).astype(jnp.float32)             # [4, J, B]

    # Batch tile: full batch if it fits in one lane-dense block, otherwise a
    # 128-multiple tile so partial boundary blocks stay legal.  Per-step
    # working set at TB=1024, J=52 is ~3 MiB double-buffered -> fits the
    # default scoped VMEM on v5e (16 MiB), v6e (32 MiB) and v7x (32 MiB).
    TB = B if B <= batch_tile else batch_tile

    out = pl.pallas_call(
        _fk_kernel,
        out_shape=jax.ShapeDtypeStruct((3, J, B), jnp.float32),
        grid=(pl.cdiv(B, TB),),
        in_specs=[
            pl.BlockSpec((4, J, TB), lambda i: (0, 0, i)),   # rotations (batch-tiled)
            pl.BlockSpec((3, J, 1), lambda i: (0, 0, 0)),    # offsets (constant)
            pl.BlockSpec((J, J), lambda i: (0, 0)),          # ancestor matrix (constant)
        ],
        out_specs=pl.BlockSpec((3, J, TB), lambda i: (0, 0, i)),
        compiler_params=pltpu.CompilerParams(
            dimension_semantics=("parallel",)),              # megacore-shard the batch axis
    )(rot, off, anc)

    return jnp.transpose(out, (2, 1, 0))  # [B, J, 3]


def _fk_reference(rotations, initial_skeleton, parent_indices):
    """Pure-JAX reference mirroring the PyTorch loop (no quat normalization)."""
    B, J, _ = rotations.shape
    w, x, y, z = (rotations[..., 0], rotations[..., 1],
                  rotations[..., 2], rotations[..., 3])
    R = jnp.stack([
        jnp.stack([1 - 2 * (y**2 + z**2), 2 * (x*y - z*w), 2 * (x*z + y*w)], -1),
        jnp.stack([2 * (x*y + z*w), 1 - 2 * (x**2 + z**2), 2 * (y*z - x*w)], -1),
        jnp.stack([2 * (x*z - y*w), 2 * (y*z + x*w), 1 - 2 * (x**2 + y**2)], -1),
    ], -2)  # [B, J, 3, 3]
    joints = [None] * J
    for j in range(J):
        p = parent_indices[j]
        if p == -1:
            joints[j] = jnp.zeros((B, 3), jnp.float32)
        else:
            off = initial_skeleton[j] - initial_skeleton[p]
            joints[j] = joints[p] + jnp.einsum('bij,j->bi', R[:, j], off)
    return jnp.stack(joints, axis=1)


if __name__ == "__main__":
    B, J = 2, 8
    parent_indices = [-1, 0, 1, 2, 0, 4, 5, 6]  # small two-branch chain

    key = jax.random.PRNGKey(0)
    k1, k2 = jax.random.split(key)
    rotations = jax.random.normal(k1, (B, J, 4), dtype=jnp.float32)
    initial_skeleton = jax.random.normal(k2, (J, 3), dtype=jnp.float32)

    joints = forward_kinematics(rotations, initial_skeleton, parent_indices)
    joints = jax.block_until_ready(joints)

    ref = _fk_reference(rotations, initial_skeleton, parent_indices)
    np.testing.assert_allclose(np.asarray(joints), np.asarray(ref),
                               rtol=1e-5, atol=1e-5)
    assert joints.shape == (B, J, 3) and joints.dtype == jnp.float32

    print("KERNEL_OK")
</pallas_src>

<mosaic_0001>
module attributes {stable_mosaic.version = 11 : i64} {
  func.func @_fk_kernel(%arg0: i32, %arg1: memref<4x8x2xf32, #tpu.memory_space<vmem>>, %arg2: memref<3x8x1xf32, #tpu.memory_space<vmem>>, %arg3: memref<8x8xf32, #tpu.memory_space<vmem>>, %arg4: memref<3x8x2xf32, #tpu.memory_space<vmem>>) attributes {dimension_semantics = [#tpu.dimension_semantics<parallel>], iteration_bounds = array<i64: 1>, scalar_prefetch = 0 : i64, scratch_operands = 0 : i64, tpu.core_type = #tpu.core_type<tc>, window_params = [{transform_indices = @transform_0, window_bounds = array<i64: 4, 8, 2>}, {pipeline_mode = #tpu.pipeline_mode<synchronous>, transform_indices = @transform_1, window_bounds = array<i64: 3, 8, 1>}, {pipeline_mode = #tpu.pipeline_mode<synchronous>, transform_indices = @transform_2, window_bounds = array<i64: 8, 8>}, {transform_indices = @transform_3, window_bounds = array<i64: 3, 8, 2>}]} {
    %c0 = arith.constant 0 : index
    %c0_0 = arith.constant 0 : index
    %c0_1 = arith.constant 0 : index
    %0 = vector.load %arg1[%c0, %c0_0, %c0_1] : memref<4x8x2xf32, #tpu.memory_space<vmem>>, vector<1x8x2xf32>
    %1 = vector.shape_cast %0 : vector<1x8x2xf32> to vector<8x2xf32>
    %c1 = arith.constant 1 : index
    %c0_2 = arith.constant 0 : index
    %c0_3 = arith.constant 0 : index
    %2 = vector.load %arg1[%c1, %c0_2, %c0_3] : memref<4x8x2xf32, #tpu.memory_space<vmem>>, vector<1x8x2xf32>
    %3 = vector.shape_cast %2 : vector<1x8x2xf32> to vector<8x2xf32>
    %c2 = arith.constant 2 : index
    %c0_4 = arith.constant 0 : index
    %c0_5 = arith.constant 0 : index
    %4 = vector.load %arg1[%c2, %c0_4, %c0_5] : memref<4x8x2xf32, #tpu.memory_space<vmem>>, vector<1x8x2xf32>
    %5 = vector.shape_cast %4 : vector<1x8x2xf32> to vector<8x2xf32>
    %c3 = arith.constant 3 : index
    %c0_6 = arith.constant 0 : index
    %c0_7 = arith.constant 0 : index
    %6 = vector.load %arg1[%c3, %c0_6, %c0_7] : memref<4x8x2xf32, #tpu.memory_space<vmem>>, vector<1x8x2xf32>
    %7 = vector.shape_cast %6 : vector<1x8x2xf32> to vector<8x2xf32>
    %c0_8 = arith.constant 0 : index
    %c0_9 = arith.constant 0 : index
    %c0_10 = arith.constant 0 : index
    %8 = vector.load %arg2[%c0_8, %c0_9, %c0_10] : memref<3x8x1xf32, #tpu.memory_space<vmem>>, vector<1x8x1xf32>
    %9 = vector.shape_cast %8 : vector<1x8x1xf32> to vector<8x1xf32>
    %c1_11 = arith.constant 1 : index
    %c0_12 = arith.constant 0 : index
    %c0_13 = arith.constant 0 : index
    %10 = vector.load %arg2[%c1_11, %c0_12, %c0_13] : memref<3x8x1xf32, #tpu.memory_space<vmem>>, vector<1x8x1xf32>
    %11 = vector.shape_cast %10 : vector<1x8x1xf32> to vector<8x1xf32>
    %c2_14 = arith.constant 2 : index
    %c0_15 = arith.constant 0 : index
    %c0_16 = arith.constant 0 : index
    %12 = vector.load %arg2[%c2_14, %c0_15, %c0_16] : memref<3x8x1xf32, #tpu.memory_space<vmem>>, vector<1x8x1xf32>
    %13 = vector.shape_cast %12 : vector<1x8x1xf32> to vector<8x1xf32>
    %14 = arith.mulf %3, %3 : vector<8x2xf32>
    %15 = arith.mulf %5, %5 : vector<8x2xf32>
    %16 = arith.mulf %7, %7 : vector<8x2xf32>
    %17 = arith.mulf %3, %5 : vector<8x2xf32>
    %18 = arith.mulf %3, %7 : vector<8x2xf32>
    %19 = arith.mulf %5, %7 : vector<8x2xf32>
    %20 = arith.mulf %1, %3 : vector<8x2xf32>
    %21 = arith.mulf %1, %5 : vector<8x2xf32>
    %22 = arith.mulf %1, %7 : vector<8x2xf32>
    %23 = arith.addf %15, %16 : vector<8x2xf32>
    %cst = arith.constant 2.000000e+00 : f32
    %24 = vector.broadcast %cst : f32 to vector<8x2xf32>
    %25 = arith.mulf %24, %23 : vector<8x2xf32>
    %cst_17 = arith.constant 1.000000e+00 : f32
    %26 = vector.broadcast %cst_17 : f32 to vector<8x2xf32>
    %27 = arith.subf %26, %25 : vector<8x2xf32>
    %28 = arith.subf %17, %22 : vector<8x2xf32>
    %cst_18 = arith.constant 2.000000e+00 : f32
    %29 = vector.broadcast %cst_18 : f32 to vector<8x2xf32>
    %30 = arith.mulf %29, %28 : vector<8x2xf32>
    %31 = arith.addf %18, %21 : vector<8x2xf32>
    %cst_19 = arith.constant 2.000000e+00 : f32
    %32 = vector.broadcast %cst_19 : f32 to vector<8x2xf32>
    %33 = arith.mulf %32, %31 : vector<8x2xf32>
    %34 = arith.addf %17, %22 : vector<8x2xf32>
    %cst_20 = arith.constant 2.000000e+00 : f32
    %35 = vector.broadcast %cst_20 : f32 to vector<8x2xf32>
    %36 = arith.mulf %35, %34 : vector<8x2xf32>
    %37 = arith.addf %14, %16 : vector<8x2xf32>
    %cst_21 = arith.constant 2.000000e+00 : f32
    %38 = vector.broadcast %cst_21 : f32 to vector<8x2xf32>
    %39 = arith.mulf %38, %37 : vector<8x2xf32>
    %cst_22 = arith.constant 1.000000e+00 : f32
    %40 = vector.broadcast %cst_22 : f32 to vector<8x2xf32>
    %41 = arith.subf %40, %39 : vector<8x2xf32>
    %42 = arith.subf %19, %20 : vector<8x2xf32>
    %cst_23 = arith.constant 2.000000e+00 : f32
    %43 = vector.broadcast %cst_23 : f32 to vector<8x2xf32>
    %44 = arith.mulf %43, %42 : vector<8x2xf32>
    %45 = arith.subf %18, %21 : vector<8x2xf32>
    %cst_24 = arith.constant 2.000000e+00 : f32
    %46 = vector.broadcast %cst_24 : f32 to vector<8x2xf32>
    %47 = arith.mulf %46, %45 : vector<8x2xf32>
    %48 = arith.addf %19, %20 : vector<8x2xf32>
    %cst_25 = arith.constant 2.000000e+00 : f32
    %49 = vector.broadcast %cst_25 : f32 to vector<8x2xf32>
    %50 = arith.mulf %49, %48 : vector<8x2xf32>
    %51 = arith.addf %14, %15 : vector<8x2xf32>
    %cst_26 = arith.constant 2.000000e+00 : f32
    %52 = vector.broadcast %cst_26 : f32 to vector<8x2xf32>
    %53 = arith.mulf %52, %51 : vector<8x2xf32>
    %cst_27 = arith.constant 1.000000e+00 : f32
    %54 = vector.broadcast %cst_27 : f32 to vector<8x2xf32>
    %55 = arith.subf %54, %53 : vector<8x2xf32>
    %56 = vector.broadcast %9 : vector<8x1xf32> to vector<8x2xf32>
    %57 = arith.mulf %27, %56 : vector<8x2xf32>
    %58 = vector.broadcast %11 : vector<8x1xf32> to vector<8x2xf32>
    %59 = arith.mulf %30, %58 : vector<8x2xf32>
    %60 = arith.addf %57, %59 : vector<8x2xf32>
    %61 = vector.broadcast %13 : vector<8x1xf32> to vector<8x2xf32>
    %62 = arith.mulf %33, %61 : vector<8x2xf32>
    %63 = arith.addf %60, %62 : vector<8x2xf32>
    %64 = vector.broadcast %9 : vector<8x1xf32> to vector<8x2xf32>
    %65 = arith.mulf %36, %64 : vector<8x2xf32>
    %66 = vector.broadcast %11 : vector<8x1xf32> to vector<8x2xf32>
    %67 = arith.mulf %41, %66 : vector<8x2xf32>
    %68 = arith.addf %65, %67 : vector<8x2xf32>
    %69 = vector.broadcast %13 : vector<8x1xf32> to vector<8x2xf32>
    %70 = arith.mulf %44, %69 : vector<8x2xf32>
    %71 = arith.addf %68, %70 : vector<8x2xf32>
    %72 = vector.broadcast %9 : vector<8x1xf32> to vector<8x2xf32>
    %73 = arith.mulf %47, %72 : vector<8x2xf32>
    %74 = vector.broadcast %11 : vector<8x1xf32> to vector<8x2xf32>
    %75 = arith.mulf %50, %74 : vector<8x2xf32>
    %76 = arith.addf %73, %75 : vector<8x2xf32>
    %77 = vector.broadcast %13 : vector<8x1xf32> to vector<8x2xf32>
    %78 = arith.mulf %55, %77 : vector<8x2xf32>
    %79 = arith.addf %76, %78 : vector<8x2xf32>
    %c0_28 = arith.constant 0 : index
    %c0_29 = arith.constant 0 : index
    %80 = vector.load %arg3[%c0_28, %c0_29] : memref<8x8xf32, #tpu.memory_space<vmem>>, vector<8x8xf32>
    %cst_30 = arith.constant dense<0.000000e+00> : vector<8x2xf32>
    %81 = tpu.matmul %80, %63, %cst_30 {dimension_numbers = #tpu.dot_dimension_numbers<[1], [0], [0], [1], [0, 0, 1, 1], [], []>} : vector<8x8xf32>, vector<8x2xf32>, vector<8x2xf32> -> vector<8x2xf32>
    %c0_31 = arith.constant 0 : index
    %c0_32 = arith.constant 0 : index
    %c0_33 = arith.constant 0 : index
    %82 = vector.load %arg4[%c0_31, %c0_32, %c0_33] : memref<3x8x2xf32, #tpu.memory_space<vmem>>, vector<1x8x2xf32>
    %83 = vector.shape_cast %82 : vector<1x8x2xf32> to vector<8x2xf32>
    %84 = vector.shape_cast %81 : vector<8x2xf32> to vector<1x8x2xf32>
    tpu.vector_store %arg4[%c0_31, %c0_32, %c0_33], %84 {strides = array<i32>} : memref<3x8x2xf32, #tpu.memory_space<vmem>>, vector<1x8x2xf32>,
    %cst_34 = arith.constant dense<0.000000e+00> : vector<8x2xf32>
    %85 = tpu.matmul %80, %71, %cst_34 {dimension_numbers = #tpu.dot_dimension_numbers<[1], [0], [0], [1], [0, 0, 1, 1], [], []>} : vector<8x8xf32>, vector<8x2xf32>, vector<8x2xf32> -> vector<8x2xf32>
    %c1_35 = arith.constant 1 : index
    %c0_36 = arith.constant 0 : index
    %c0_37 = arith.constant 0 : index
    %86 = vector.load %arg4[%c1_35, %c0_36, %c0_37] : memref<3x8x2xf32, #tpu.memory_space<vmem>>, vector<1x8x2xf32>
    %87 = vector.shape_cast %86 : vector<1x8x2xf32> to vector<8x2xf32>
    %88 = vector.shape_cast %85 : vector<8x2xf32> to vector<1x8x2xf32>
    tpu.vector_store %arg4[%c1_35, %c0_36, %c0_37], %88 {strides = array<i32>} : memref<3x8x2xf32, #tpu.memory_space<vmem>>, vector<1x8x2xf32>,
    %cst_38 = arith.constant dense<0.000000e+00> : vector<8x2xf32>
    %89 = tpu.matmul %80, %79, %cst_38 {dimension_numbers = #tpu.dot_dimension_numbers<[1], [0], [0], [1], [0, 0, 1, 1], [], []>} : vector<8x8xf32>, vector<8x2xf32>, vector<8x2xf32> -> vector<8x2xf32>
    %c2_39 = arith.constant 2 : index
    %c0_40 = arith.constant 0 : index
    %c0_41 = arith.constant 0 : index
    %90 = vector.load %arg4[%c2_39, %c0_40, %c0_41] : memref<3x8x2xf32, #tpu.memory_space<vmem>>, vector<1x8x2xf32>
    %91 = vector.shape_cast %90 : vector<1x8x2xf32> to vector<8x2xf32>
    %92 = vector.shape_cast %89 : vector<8x2xf32> to vector<1x8x2xf32>
    tpu.vector_store %arg4[%c2_39, %c0_40, %c0_41], %92 {strides = array<i32>} : memref<3x8x2xf32, #tpu.memory_space<vmem>>, vector<1x8x2xf32>,
    return
  }
  func.func @transform_0(%arg0: i32) -> (i32, i32, i32) {
    %c0_i32 = arith.constant 0 : i32
    %c0_i32_0 = arith.constant 0 : i32
    %c0_i32_1 = arith.constant 0 : i32
    return %c0_i32, %c0_i32_0, %arg0 : i32, i32, i32
  }
  func.func @transform_1(%arg0: i32) -> (i32, i32, i32) {
    %c0_i32 = arith.constant 0 : i32
    %c0_i32_0 = arith.constant 0 : i32
    %c0_i32_1 = arith.constant 0 : i32
    %c0_i32_2 = arith.constant 0 : i32
    return %c0_i32, %c0_i32_0, %c0_i32_1 : i32, i32, i32
  }
  func.func @transform_2(%arg0: i32) -> (i32, i32) {
    %c0_i32 = arith.constant 0 : i32
    %c0_i32_0 = arith.constant 0 : i32
    %c0_i32_1 = arith.constant 0 : i32
    return %c0_i32, %c0_i32_0 : i32, i32
  }
  func.func @transform_3(%arg0: i32) -> (i32, i32, i32) {
    %c0_i32 = arith.constant 0 : i32
    %c0_i32_0 = arith.constant 0 : i32
    %c0_i32_1 = arith.constant 0 : i32
    return %c0_i32, %c0_i32_0, %arg0 : i32, i32, i32
  }
}

</mosaic_0001>

<bundles_post_ra>
// kernel: tpu_custom_call.1
= control target key start
LH: loop header
LB: loop body
LE: loop exit
PB: predicated region body
PF: predicated region fallthrough
CT: control target
= control target key end

     0   :  { %v174_v0 = vmov 0   ;;  %vm87_vm0 = vcmask 64512   ;;  %vm111_vm1 = vcmask 15360   ;;  %s228_s1 = inlined_call_operand.vmem [shape: f32[3,8,1], index: 1, kind: input, shape index: {}]   ;;  %s229_s0 = inlined_call_operand.vmem [shape: f32[4,8,2], index: 0, kind: input, shape index: {}]   ;;  %s230_s2 = inlined_call_operand.vmem [shape: f32[8,8], index: 2, kind: input, shape index: {}]   ;;  %s231_s3 = inlined_call_operand.vmem [shape: f32[3,8,2], index: 3, kind: output, shape index: {}]  }
   0x1   :  { %172 = vset.pattern.permute.xlu0 %v174_v0  ;;  %v21_v1 = vld [vmem:[%s228_s1] sm:$0xff]  ;;  %173 = vset.pattern.permute.xlu1 %v174_v0  ;;  %v165_v2 = vld [vmem:[%s228_s1 + $0x10] sm:$0xff]  ;;  %v164_v3 = vld [vmem:[%s228_s1 + $0x8] sm:$0xff] }
   0x2   :  { %58 = vperm.xlu0 %172, %v21_v1   ;;  %71 = vperm.xlu1 %173, %v165_v2   ;;  %v162_v4 = vld [vmem:[%s229_s0 + $0x10] sm:$0xff]  ;;  %v163_v5 = vld [vmem:[%s229_s0 + $0x18] sm:$0xff]  ;;  %v161_v8 = vld [vmem:[%s229_s0 + $0x8] sm:$0xff] }
   0x3   :  { %v27_v6 = vmul.f32 %v162_v4, %v162_v4  ;;  %v28_v7 = vmul.f32 %v163_v5, %v163_v5  ;;  %v14_v9 = vld [vmem:[%s229_s0] sm:$0xff]  ;;  %v26_v10 = vmul.f32 %v161_v8, %v161_v8  ;;  %v29_v12 = vmul.f32 %v162_v4, %v161_v8 }
   0x4   :  { %v30_v13 = vmul.f32 %v163_v5, %v161_v8  ;;  %v33_v14 = vmul.f32 %v162_v4, %v14_v9  ;;  %v34_v15 = vmul.f32 %v163_v5, %v14_v9  ;;  %v31_v16 = vmul.f32 %v163_v5, %v162_v4  ;;  %v86_v56 = vld [vmem:[%s230_s2] sm:$0xff] }
   0x5   :  { %v35_v11 = vadd.f32 %v28_v7, %v27_v6  ;;  %v32_v17 = vmul.f32 %v161_v8, %v14_v9  ;;  %v44_v18 = vadd.f32 %v28_v7, %v26_v10  ;;  %v53_v19 = vadd.f32 %v27_v6, %v26_v10 }
   0x6   :  { %v42_v22 = vadd.f32 %v34_v15, %v29_v12  ;;  %v49_v23 = vsub.f32 %v30_v13, %v33_v14  ;;  %v40_v24 = vadd.f32 %v33_v14, %v30_v13  ;;  %v38_v26 = vsub.f32 %v29_v12, %v34_v15 }
   0x7   :  { %v36_v20 = vmul.f32 2.0, %v35_v11  ;;  %v47_v25 = vsub.f32 %v31_v16, %v32_v17  ;;  %v45_v27 = vmul.f32 2.0, %v44_v18  ;;  %v51_v28 = vadd.f32 %v32_v17, %v31_v16 }
   0x8   :  { %v54_v29 = vmul.f32 2.0, %v53_v19  ;;  %v43_v31 = vmul.f32 2.0, %v42_v22  ;;  %v50_v32 = vmul.f32 2.0, %v49_v23  ;;  %v41_v33 = vmul.f32 2.0, %v40_v24 }
   0x9   :  { %v37_v30 = vsub.f32 1.0, %v36_v20  ;;  %v48_v34 = vmul.f32 2.0, %v47_v25  ;;  %v39_v35 = vmul.f32 2.0, %v38_v26  ;;  %v46_v36 = vsub.f32 1.0, %v45_v27 }
   0xa   :  { %64 = vperm.xlu0 %172, %v164_v3   ;;  %v52_v37 = vmul.f32 2.0, %v51_v28  ;;  %v55_v39 = vsub.f32 1.0, %v54_v29 }
  0x74   :  { %v59_v21 = vpop.permute.xlu0 %58  ;;  %v72_v38 = vpop.permute.xlu1 %71 }
  0x75   :  { %v61_v40 = vmul.f32 %v59_v21, %v37_v30  ;;  %v76_v41 = vmul.f32 %v59_v21, %v43_v31  ;;  %v81_v42 = vmul.f32 %v59_v21, %v50_v32  ;;  %v74_v44 = vmul.f32 %v72_v38, %v41_v33 }
  0x76   :  { %v79_v45 = vmul.f32 %v72_v38, %v48_v34  ;;  %v84_v49 = vmul.f32 %v72_v38, %v55_v39 }
  0x7c   :  { %v65_v43 = vpop.permute.xlu0 %64 }
  0x7d   :  { %v67_v46 = vmul.f32 %v65_v43, %v39_v35  ;;  %v77_v47 = vmul.f32 %v65_v43, %v46_v36  ;;  %v82_v48 = vmul.f32 %v65_v43, %v52_v37 }
  0x7f   :  { %v68_v50 = vadd.f32 %v67_v46, %v61_v40  ;;  %v78_v51 = vadd.f32 %v77_v47, %v76_v41  ;;  %v83_v52 = vadd.f32 %v82_v48, %v81_v42 }
  0x81   :  { %v75_v53 = vadd.f32 %v74_v44, %v68_v50  ;;  %v80_v54 = vadd.f32 %v79_v45, %v78_v51  ;;  %v85_v55 = vadd.f32 %v84_v49, %v83_v52 }
  0x83   :  { %106 = vmatpush.msra.mxu0 %v75_v53  ;;  %128 = vmatpush.msra.mxu1 %v80_v54 }
  0x84   :  { %150 = vmatpush.msra.mxu2 %v85_v55  ;;  %166 = vmatmul.msk.f32.vlgmr.msra.gmra.mxu0 %vm87_vm0, %v86_v56 }
  0x85   :  { %169 = vmatmul.msk.f32.vlgmr.msra.gmra.mxu2 %vm87_vm0, %v86_v56  ;;  %167 = vmatmul.msk.f32.vlgmr.msra.gmra.mxu1 %vm87_vm0, %v86_v56 }
 0x101   :  { %v108_v57 = vpop.f32.mrf.mxu0 }
 0x102   :  { %112 = vst.msk [vmem:[%s231_s3] sm:$0xff] %vm111_vm1, %v108_v57  ;;  %v130_v58 = vpop.f32.mrf.mxu1 }
 0x103   :  { %168 = vst.msk [vmem:[%s231_s3 + $0x8] sm:$0xff] %vm111_vm1, %v130_v58 }
 0x108   :  { %v152_v59 = vpop.f32.mrf.mxu2 }
 0x109   :  { %170 = vst.msk [vmem:[%s231_s3 + $0x10] sm:$0xff] %vm111_vm1, %v152_v59 }

</bundles_post_ra>
